<compile_context>
chip_gen: v6e
topology: v6e:2x2x1
jax: 0.10.0
libtpu: 0.0.40
codegen_flags: <defaults>
</compile_context>

<pallas_src>
import functools

import jax
import jax.numpy as jnp
from jax.experimental import pallas as pl
from jax.experimental.pallas import tpu as pltpu


def _linear_clamp_kernel(x_ref, wt_ref, b_ref, o_ref, *, min_value, max_value):
    # x_ref: (B, IN), wt_ref: (IN, OUT) pre-transposed, b_ref: (1, OUT)
    x = x_ref[...].astype(jnp.float32)
    wt = wt_ref[...].astype(jnp.float32)
    y = b_ref[...].astype(jnp.float32)          # (1, OUT) -> broadcasts over batch

    in_features = wt_ref.shape[0]               # static (3)
    # Tiny contraction: unrolled VPU FMAs, one per input feature.
    for k in range(in_features):
        y = y + x[:, k:k + 1] * wt[k:k + 1, :]

    # clamp_min then clamp_max with immediate constants.
    y = jnp.maximum(y, jnp.float32(min_value))
    y = jnp.minimum(y, jnp.float32(max_value))
    o_ref[...] = y.astype(o_ref.dtype)


def linear_clamp(x, weight, bias, min_value=0.0, max_value=1.0):
    B, IN = x.shape
    OUT, IN2 = weight.shape
    assert IN == IN2

    wt = weight.T                # (IN, OUT) — layout plumbing outside the kernel
    bias2d = bias.reshape(1, OUT)

    kernel = functools.partial(
        _linear_clamp_kernel,
        min_value=float(min_value),
        max_value=float(max_value),
    )

    return pl.pallas_call(
        kernel,
        out_shape=jax.ShapeDtypeStruct((B, OUT), jnp.float32),
        in_specs=[
            pl.BlockSpec(memory_space=pltpu.MemorySpace.VMEM),
            pl.BlockSpec(memory_space=pltpu.MemorySpace.VMEM),
            pl.BlockSpec(memory_space=pltpu.MemorySpace.VMEM),
        ],
        out_specs=pl.BlockSpec(memory_space=pltpu.MemorySpace.VMEM),
    )(x, wt, bias2d)


if __name__ == "__main__":
    key = jax.random.PRNGKey(0)
    kx, kw, kb = jax.random.split(key, 3)

    IN_FEATURES, OUT_FEATURES = 3, 8
    BATCH = 1

    # Deterministic parameter init (mimics PyTorch Linear's
    # uniform(-1/sqrt(fan_in), 1/sqrt(fan_in)) ranges).
    bound = 1.0 / (IN_FEATURES ** 0.5)
    weight = jax.random.uniform(
        kw, (OUT_FEATURES, IN_FEATURES), jnp.float32, -bound, bound)
    bias = jax.random.uniform(
        kb, (OUT_FEATURES,), jnp.float32, -bound, bound)

    x1 = jax.random.normal(kx, (BATCH, IN_FEATURES), jnp.float32)

    out = linear_clamp(x1, weight, bias, min_value=0.0, max_value=1.0)
    out = jax.block_until_ready(out)

    # Reference check in plain JAX.
    ref = jnp.clip(x1 @ weight.T + bias, 0.0, 1.0)
    assert out.shape == (BATCH, OUT_FEATURES)
    assert jnp.allclose(out, ref, atol=1e-5), (out, ref)

    print("KERNEL_OK")
</pallas_src>

<mosaic_0001>
module attributes {stable_mosaic.version = 11 : i64} {
  func.func @_linear_clamp_kernel(%arg0: memref<1x3xf32, #tpu.memory_space<vmem>>, %arg1: memref<3x8xf32, #tpu.memory_space<vmem>>, %arg2: memref<1x8xf32, #tpu.memory_space<vmem>>, %arg3: memref<1x8xf32, #tpu.memory_space<vmem>>) attributes {dimension_semantics = [], scalar_prefetch = 0 : i64, scratch_operands = 0 : i64, tpu.core_type = #tpu.core_type<tc>} {
    %c0 = arith.constant 0 : index
    %c0_0 = arith.constant 0 : index
    %0 = vector.load %arg0[%c0, %c0_0] : memref<1x3xf32, #tpu.memory_space<vmem>>, vector<1x3xf32>
    %c0_1 = arith.constant 0 : index
    %c0_2 = arith.constant 0 : index
    %1 = vector.load %arg1[%c0_1, %c0_2] : memref<3x8xf32, #tpu.memory_space<vmem>>, vector<3x8xf32>
    %c0_3 = arith.constant 0 : index
    %c0_4 = arith.constant 0 : index
    %2 = vector.load %arg2[%c0_3, %c0_4] : memref<1x8xf32, #tpu.memory_space<vmem>>, vector<1x8xf32>
    %3 = vector.extract_strided_slice %0 {offsets = [0, 0], sizes = [1, 1], strides = [1, 1]} : vector<1x3xf32> to vector<1x1xf32>
    %4 = vector.extract_strided_slice %1 {offsets = [0, 0], sizes = [1, 8], strides = [1, 1]} : vector<3x8xf32> to vector<1x8xf32>
    %5 = vector.broadcast %3 : vector<1x1xf32> to vector<1x8xf32>
    %6 = arith.mulf %5, %4 : vector<1x8xf32>
    %7 = arith.addf %2, %6 : vector<1x8xf32>
    %8 = vector.extract_strided_slice %0 {offsets = [0, 1], sizes = [1, 1], strides = [1, 1]} : vector<1x3xf32> to vector<1x1xf32>
    %9 = vector.extract_strided_slice %1 {offsets = [1, 0], sizes = [1, 8], strides = [1, 1]} : vector<3x8xf32> to vector<1x8xf32>
    %10 = vector.broadcast %8 : vector<1x1xf32> to vector<1x8xf32>
    %11 = arith.mulf %10, %9 : vector<1x8xf32>
    %12 = arith.addf %7, %11 : vector<1x8xf32>
    %13 = vector.extract_strided_slice %0 {offsets = [0, 2], sizes = [1, 1], strides = [1, 1]} : vector<1x3xf32> to vector<1x1xf32>
    %14 = vector.extract_strided_slice %1 {offsets = [2, 0], sizes = [1, 8], strides = [1, 1]} : vector<3x8xf32> to vector<1x8xf32>
    %15 = vector.broadcast %13 : vector<1x1xf32> to vector<1x8xf32>
    %16 = arith.mulf %15, %14 : vector<1x8xf32>
    %17 = arith.addf %12, %16 : vector<1x8xf32>
    %cst = arith.constant 0.000000e+00 : f32
    %18 = vector.broadcast %cst : f32 to vector<1x8xf32>
    %19 = arith.maximumf %17, %18 : vector<1x8xf32>
    %cst_5 = arith.constant 1.000000e+00 : f32
    %20 = vector.broadcast %cst_5 : f32 to vector<1x8xf32>
    %21 = arith.minimumf %19, %20 : vector<1x8xf32>
    %c0_6 = arith.constant 0 : index
    %c0_7 = arith.constant 0 : index
    %22 = vector.load %arg3[%c0_6, %c0_7] : memref<1x8xf32, #tpu.memory_space<vmem>>, vector<1x8xf32>
    tpu.vector_store %arg3[%c0_6, %c0_7], %21 {strides = array<i32>} : memref<1x8xf32, #tpu.memory_space<vmem>>, vector<1x8xf32>,
    return
  }
}

</mosaic_0001>

<bundles_post_ra>
// kernel: tpu_custom_call.1
= control target key start
LH: loop header
LB: loop body
LE: loop exit
PB: predicated region body
PF: predicated region fallthrough
CT: control target
= control target key end

     0   :  { %8 = vsyncpa [#allocation3], 0  ;;  %s242_s0 = inlined_call_operand.hbm [shape: f32[1,3], index: 0, kind: input, shape index: {}]   ;;  %s243_s1 = inlined_call_operand.hbm [shape: f32[3,8], index: 1, kind: input, shape index: {}]   ;;  %s244_s2 = inlined_call_operand.vmem [shape: f32[1,8], index: 2, kind: input, shape index: {}]   ;;  %s245_s3 = inlined_call_operand.hbm [shape: f32[1,8], index: 3, kind: output, shape index: {}]  }
   0x1   :  { %9 = vsyncpa [#allocation6], 0 }
   0x2   :  { %10 = vsyncpa [#allocation4], 0  ;;  %s203_s12 = smov [#allocation2]   ;;  %s204_s14 = smov [#allocation5]  }
   0x3   :  { %s17_s13 = sshll.u32 %s203_s12, 4  ;;  %s27_s15 = sshll.u32 %s204_s14, 4  ;;  %s18_s13 = int_to_ptr.vmem [resolvable:$true] %s17_s13  ;;  %s28_s15 = int_to_ptr.vmem [resolvable:$true] %s27_s15 }
   0x4   :  { %s145_s16 = scalar_lea.vmem %s18_s13, 16  ;;  %s149_s17 = scalar_lea.vmem %s18_s13, 32 }
   0x5   :  { %p146_p0 = scmp.ne.s32.totalorder %s18_s13, %s145_s16  ;;  %p150_p1 = scmp.lt.s32.totalorder %s18_s13, %s18_s13 }
   0x6   :  { %p151_p2 = scmp.lt.s32.totalorder %s149_s17, %s145_s16 }
   0x8   :  { %p152_p3 = por %p151_p2, %p150_p1 }
   0xa   :  { %p153_p4 = pnand %p152_p3, %p146_p0 }
   0xc   :  { %156 = shalt.err (!%p153_p4)
}
   0xd   :  { %20 = dma.hbm_to_vmem [thread:$0]  %s242_s0, 16, %s18_s13, [#allocation3]  }
   0xe   :  { %s165_s20 = scalar_lea.vmem %s28_s15, 64  ;;  %p170_p6 = scmp.lt.s32.totalorder %s28_s15, %s28_s15 }
   0xf   :  { %p166_p5 = scmp.ne.s32.totalorder %s28_s15, %s165_s20  ;;  %p171_p7 = scmp.lt.s32.totalorder %s165_s20, %s165_s20 }
  0x11   :  { %p172_p8 = por %p171_p7, %p170_p6 }
  0x13   :  { %p173_p9 = pnand %p172_p8, %p166_p5 }
  0x15   :  { %176 = shalt.err (!%p173_p9)
}
  0x16   :  { %30 = dma.hbm_to_vmem [thread:$0]  %s243_s1, 64, %s28_s15, [#allocation6]  }
  0x17   :  { %197 = dma.done.wait [#allocation3], 16  }
  0x18   :  { %198 = vsyncadd [#allocation3], 4294967280 }
  0x19   :  { %199 = dma.done.wait [#allocation6], 64  }
  0x1a   :  { %200 = vsyncadd [#allocation6], 4294967232  ;;  %v205_v0 = vmov 1   ;;  %v206_v1 = vmov 0   ;;  %v39_v2 = vld [vmem:[#allocation2] sm:$0x1]  ;;  %v47_v4 = vlaneseq }
  0x1b   :  { %134 = vset.pattern.permute.xlu0 %v205_v0  ;;  %136 = vset.pattern.permute.xlu1 %v206_v1  ;;  %v207_v3 = vmov 2   ;;  %v208_v6 = vmov 1966171168   ;;  %v40_v10 = vld [vmem:[#allocation5] sm:$0x7]  ;;  %s209_s23 = smov [#allocation7]  }
  0x1c   :  { %54 = vperm.xlu0 %134, %v39_v2   ;;  %44 = vperm.xlu1 %136, %v39_v2   ;;  %v48_v5 = vshrl.u32 %v47_v4, 7  ;;  %v64_v7 = vunpack.c.l.s4 %v208_v6  ;;  %v41_v22 = vld [vmem:[%s244_s2] sm:$0x1]  ;;  %s117_s24 = sshll.u32 %s209_s23, 4  ;;  %vm109_vm0 = vcmask 57344   ;;  %s118_s24 = int_to_ptr.vmem [resolvable:$true] %s117_s24 }
  0x1d   :  { %s177_s25 = scalar_lea.vmem %s118_s24, 16  ;;  %s181_s26 = scalar_lea.vmem %s118_s24, 32 }
  0x1e   :  { %v49_v8 = vsub.s32 0, %v48_v5  ;;  %v65_v9 = vunpack.c.0.s8 %v64_v7  ;;  %p178_p10 = scmp.ne.s32.totalorder %s118_s24, %s177_s25  ;;  %p182_p11 = scmp.lt.s32.totalorder %s118_s24, %s118_s24 }
  0x1f   :  { %p183_p12 = scmp.lt.s32.totalorder %s181_s26, %s177_s25 }
  0x20   :  { %135 = vset.pattern.permute.xlu0 %v207_v3  ;;  %v68_v13 = vsub.s32 %v65_v9, %v48_v5 }
  0x21   :  { %81 = vperm.xlu0 %135, %v39_v2   ;;  %p184_p13 = por %p183_p12, %p182_p11 }
  0x23   :  { %p185_p0 = pnand %p184_p13, %p178_p10 }
  0x97   :  { %v55_v11 = vpop.permute.xlu0 %54  ;;  %v45_v12 = vpop.permute.xlu1 %44 }
  0x98   :  { %v60_v14 = vrot.slane %v55_v11, %v49_v8  ;;  %v50_v15 = vrot.slane %v45_v12, %v49_v8 }
  0x9a   :  { %v61_v16 = vmul.f32 %v60_v14, %v40_v10  ;;  %v51_v19 = vmul.f32 %v50_v15, %v40_v10 }
  0x9c   :  { %v69_v17 = vrot.slane %v61_v16, %v68_v13  ;;  %v82_v18 = vpop.permute.xlu0 %81  ;;  %v52_v25 = vadd.f32 %v51_v19, %v41_v22 }
  0x9d   :  { %v87_v20 = vrot.slane %v82_v18, %v49_v8 }
  0x9e   :  { %v70_v21 = vcombine.high %v69_v17, %v69_v17 }
  0x9f   :  { %v88_v23 = vmul.f32 %v87_v20, %v40_v10 }
  0xa0   :  { %v77_v24 = vrot.slane %v70_v21, %v68_v13 }
  0xa1   :  { %v96_v26 = vrot.slane %v88_v23, %v68_v13 }
  0xa2   :  { %v79_v28 = vadd.f32 %v77_v24, %v52_v25 }
  0xa3   :  { %v103_v27 = vrot.slane %v96_v26, %v68_v13 }
  0xa5   :  { %v104_v29 = vcombine.high %v103_v27, %v103_v27 }
  0xa7   :  { %v106_v30 = vadd.f32 %v104_v29, %v79_v28 }
  0xa9   :  { %v107_v31 = vmax.f32 %v106_v30, 0.0 }
  0xab   :  { %v108_v32 = vmin.f32 %v107_v31, 1.0 }
  0xad   :  { %110 = vst.msk [vmem:[#allocation7] sm:$0x1] %vm109_vm0, %v108_v32 }
  0xae   :  { %188 = shalt.err (!%p185_p0)
}
  0xaf   :  { %120 = dma.vmem_to_hbm [thread:$0]  %s118_s24, 16, %s245_s3, [#allocation4]  }
  0xb0   :  { %201 = dma.done.wait [#allocation4], 16  }
  0xb1   :  { %202 = vsyncadd [#allocation4], 4294967280 }
  0xb2   :  { %124 = vsyncpa [#allocation3], 1 }
  0xb3   :  { %125 = vsyncpa [#allocation6], 1 }
  0xb4   :  { %126 = vsyncpa [#allocation4], 1 }

</bundles_post_ra>
